<compile_context>
chip_gen: v6e
topology: v6e:2x2x1
jax: 0.10.0
libtpu: 0.0.40
codegen_flags: <defaults>
</compile_context>

<pallas_src>
import math

import jax
import jax.numpy as jnp
from jax import lax
from jax.experimental import pallas as pl
from jax.experimental.pallas import tpu as pltpu


def _make_mhsa_kernel(Bt, N, C, D, compute_dtype):
    """Kernel for one grid step = (batch tile i, head h)."""
    M = Bt * N  # rows fed to the projection matmuls

    def kernel(x_ref, wqkv_ref, bqkv_ref, wout_ref, bout_ref, o_ref, acc_ref):
        h = pl.program_id(1)

        @pl.when(h == 0)
        def _():
            acc_ref[...] = jnp.zeros_like(acc_ref)

        # ---- fused per-head QKV projection: (M, C) x (C, 3D) on the MXU ----
        # (1/sqrt(D) scale is folded into the Q columns / bias in the wrapper)
        x_flat = x_ref[...].reshape(M, C)
        qkv = jnp.dot(x_flat, wqkv_ref[0],
                      preferred_element_type=jnp.float32)        # (M, 3D) f32
        qkv = qkv + bqkv_ref[0]                                  # (1, 3D) f32 bias

        q = qkv[:, :D].reshape(Bt, N, D).astype(compute_dtype)
        k = qkv[:, D:2 * D].reshape(Bt, N, D).astype(compute_dtype)
        v = qkv[:, 2 * D:].reshape(Bt, N, D).astype(compute_dtype)

        # ---- attention for this head, batched over the batch tile ----------
        # scores 'bqd,bkd->bqk' (f32 accumulate)
        s = lax.dot_general(q, k, (((2,), (2,)), ((0,), (0,))),
                            preferred_element_type=jnp.float32)  # (Bt, N, N)

        # numerically-stable softmax; statistics kept in f32
        m = jnp.max(s, axis=-1, keepdims=True)
        p = jnp.exp(s - m)                                       # (Bt, N, N)
        l = jnp.sum(p, axis=-1, keepdims=True)                   # (Bt, N, 1)

        # weighted values 'bqk,bkd->bqd'
        o = lax.dot_general(p.astype(compute_dtype), v,
                            (((2,), (1,)), ((0,), (0,))),
                            preferred_element_type=jnp.float32)  # (Bt, N, D)
        o = o / l                                                # exact normalization

        # ---- head merge fused into the output projection --------------------
        # accumulate this head's (M, D) x (D, C) contribution across the head
        # grid axis in an f32 scratch accumulator.
        o_flat = o.reshape(M, D).astype(compute_dtype)
        acc_ref[...] += jnp.dot(o_flat, wout_ref[0],
                                preferred_element_type=jnp.float32)  # (M, C)

        @pl.when(h == pl.num_programs(1) - 1)
        def _():
            y = acc_ref[...] + bout_ref[...]                     # (M, C) f32
            o_ref[...] = y.reshape(Bt, N, C).astype(o_ref.dtype)

    return kernel


def _step_vmem_bytes(Bt, N, C, D, itemsize):
    """Rough per-grid-step VMEM footprint (tiles, weights, intermediates)."""
    M = Bt * N
    x_tiles = 2 * Bt * N * C * itemsize            # double-buffered input tile
    out_tiles = 2 * Bt * N * C * itemsize          # double-buffered output tile
    weights = 2 * (C * 3 * D + D * C) * itemsize   # per-head W_qkv / W_out (x2 buf)
    biases = 2 * (3 * D + C) * 4
    acc = M * C * 4                                # f32 accumulator scratch
    qkv = M * 3 * D * 4 + 3 * M * D * itemsize     # projection result + q/k/v
    scores = 2 * Bt * N * N * 4                    # s and p (f32)
    attn_out = Bt * N * D * 4
    return x_tiles + out_tiles + weights + biases + acc + qkv + scores + attn_out


def _pick_batch_tile(B, N, C, D, itemsize, *, target_rows=256,
                     vmem_budget_bytes=48 * 1024 * 1024):
    """Batch elements per grid step.

    Give the MXU >= target_rows rows per projection matmul (256 half-fills a
    v6e/v7x 256x256 MXU; v5e's 128x128 MXU is already saturated at 128), keep
    >= 4 steps on the parallel grid axis when the batch allows (2 per
    TensorCore on v7x), and stay inside the per-step VMEM budget.
    """
    divisors = [d for d in range(1, B + 1) if B % d == 0]

    def fits(d):
        return _step_vmem_bytes(d, N, C, D, itemsize) <= vmem_budget_bytes

    for min_steps in (4, 2, 1):
        cands = [d for d in divisors if B // d >= min_steps and fits(d)]
        if not cands:
            continue
        for d in cands:
            if d * N >= target_rows:
                return d
        return cands[-1]
    return 1


def mhsa_pallas(x, w_qkv, b_qkv, w_out, b_out, num_heads, *, param_dtype=None):
    """Multi-head self-attention forward (mask=None, dropout=0.0).

    x: (B, N, C); w_qkv: (C, 3C); b_qkv: (3C,); w_out: (C, C); b_out: (C,)
    so that `x @ w_qkv + b_qkv` / `out @ w_out + b_out` are the projections.
    """
    B, N, C = x.shape
    H = num_heads
    assert C % H == 0, "embedding dimension must be divisible by number of heads"
    D = C // H
    scale = D ** (-0.5)

    cdt = jnp.dtype(param_dtype) if param_dtype is not None else x.dtype
    itemsize = jnp.dtype(cdt).itemsize

    # ---- wrapper-side weight re-layout: no in-kernel head gather ------------
    # Fold the 1/sqrt(D) attention scale into the Q projection.
    w32 = w_qkv.astype(jnp.float32).at[:, :C].multiply(scale)
    b32 = b_qkv.astype(jnp.float32).at[:C].multiply(scale)
    # Head-major QKV weights: per head h, columns [q_h | k_h | v_h] -> (H, C, 3D).
    w_qkv_h = w32.reshape(C, 3, H, D).transpose(2, 0, 1, 3).reshape(H, C, 3 * D)
    b_qkv_h = b32.reshape(3, H, D).transpose(1, 0, 2).reshape(H, 1, 3 * D)
    # Output projection split by head rows: (H, D, C).
    w_out_h = w_out.reshape(H, D, C)

    x_c = x.astype(cdt)
    w_qkv_c = w_qkv_h.astype(cdt)
    w_out_c = w_out_h.astype(cdt)
    # Biases stay f32: they are added to the f32 accumulators inside the kernel.
    b_qkv_f32 = b_qkv_h.astype(jnp.float32)
    b_out_f32 = b_out.astype(jnp.float32).reshape(1, C)

    Bt = _pick_batch_tile(B, N, C, D, itemsize)
    grid = (B // Bt, H)
    kernel = _make_mhsa_kernel(Bt, N, C, D, cdt)

    # Explicit VMEM limit from the per-step budget (scoped defaults are only
    # 16/32/32 MiB on v5e/v6e/v7x); clamp at 64 MiB = v7x physical per-core VMEM.
    est = _step_vmem_bytes(Bt, N, C, D, itemsize)
    vmem_limit = int(min(64 * 1024 * 1024, max(32 * 1024 * 1024, 2 * est)))

    return pl.pallas_call(
        kernel,
        out_shape=jax.ShapeDtypeStruct((B, N, C), cdt),
        grid=grid,
        in_specs=[
            # x batch tile: constant across the head axis -> not re-copied.
            pl.BlockSpec((Bt, N, C), lambda i, h: (i, 0, 0)),
            # Per-head weights/biases streamed along the head grid axis
            # (working set ~8*C*D bytes, so no need for single-buffering).
            pl.BlockSpec((1, C, 3 * D), lambda i, h: (h, 0, 0)),   # W_qkv[h]
            pl.BlockSpec((1, 1, 3 * D), lambda i, h: (h, 0, 0)),   # b_qkv[h] (f32)
            pl.BlockSpec((1, D, C), lambda i, h: (h, 0, 0)),       # W_out[h]
            pl.BlockSpec((1, C), lambda i, h: (0, 0)),             # b_out (f32)
        ],
        out_specs=pl.BlockSpec((Bt, N, C), lambda i, h: (i, 0, 0)),
        scratch_shapes=[pltpu.VMEM((Bt * N, C), jnp.float32)],
        compiler_params=pltpu.CompilerParams(
            dimension_semantics=("parallel", "arbitrary"),
            vmem_limit_bytes=vmem_limit),
    )(x_c, w_qkv_c, b_qkv_f32, w_out_c, b_out_f32)


def mhsa_ref(x, w_qkv, b_qkv, w_out, b_out, num_heads):
    """Pure-JAX reference mirroring the PyTorch forward exactly (f32)."""
    B, N, C = x.shape
    D = C // num_heads
    scale = D ** (-0.5)
    qkv = x @ w_qkv + b_qkv[None, None]                  # (B, N, 3C)
    qkv = qkv.reshape(B, N, 3, num_heads, D).transpose(2, 0, 3, 1, 4)
    q, k, v = qkv[0], qkv[1], qkv[2]                     # (B, H, N, D)
    attn = jnp.einsum('bhnd,bhmd->bhnm', q, k) * scale
    attn = jax.nn.softmax(attn, axis=-1)
    out = jnp.einsum('bhnm,bhmd->bhnd', attn, v)
    out = out.transpose(0, 2, 1, 3).reshape(B, N, C)
    return out @ w_out + b_out[None, None]


if __name__ == "__main__":
    # Small shapes consistent with the module: B=2, seq N=8, dim C=32, 4 heads.
    B, N, C, num_heads = 2, 8, 32, 4
    assert C % num_heads == 0

    key = jax.random.PRNGKey(0)
    kx, kw1, kb1, kw2, kb2 = jax.random.split(key, 5)

    x = jax.random.normal(kx, (B, N, C), dtype=jnp.float32)
    w_qkv = jax.random.normal(kw1, (C, 3 * C), dtype=jnp.float32) / math.sqrt(C)
    b_qkv = jax.random.normal(kb1, (3 * C,), dtype=jnp.float32) * 0.01
    w_out = jax.random.normal(kw2, (C, C), dtype=jnp.float32) / math.sqrt(C)
    b_out = jax.random.normal(kb2, (C,), dtype=jnp.float32) * 0.01

    # f32 reference at full matmul precision (the kernel accumulates in f32).
    with jax.default_matmul_precision("highest"):
        y_ref = mhsa_ref(x, w_qkv, b_qkv, w_out, b_out, num_heads)

    # f32 path (exact softmax normalization -> tight tolerance).
    y = jax.block_until_ready(mhsa_pallas(x, w_qkv, b_qkv, w_out, b_out, num_heads))
    assert y.shape == (B, N, C)
    assert jnp.allclose(y, y_ref, rtol=2e-3, atol=2e-3), "f32 mismatch vs reference"

    # bf16 params/activations with f32 accumulation & f32 softmax statistics,
    # compared against a bf16-quantized-input reference (tighter than the loose
    # f32-reference check flagged in review).
    bf = jnp.bfloat16
    x_q = x.astype(bf).astype(jnp.float32)
    w_qkv_q = w_qkv.astype(bf).astype(jnp.float32)
    w_out_q = w_out.astype(bf).astype(jnp.float32)
    with jax.default_matmul_precision("highest"):
        y_ref16 = mhsa_ref(x_q, w_qkv_q, b_qkv, w_out_q, b_out, num_heads)

    y16 = jax.block_until_ready(
        mhsa_pallas(x, w_qkv, b_qkv, w_out, b_out, num_heads, param_dtype=bf))
    assert y16.shape == (B, N, C)
    assert jnp.allclose(y16.astype(jnp.float32), y_ref16, rtol=7.5e-2, atol=7.5e-2), \
        "bf16 mismatch vs bf16-quantized reference"

    print("KERNEL_OK")
</pallas_src>

<mosaic_0001>
module attributes {stable_mosaic.version = 11 : i64} {
  func.func @kernel(%arg0: i32, %arg1: i32, %arg2: memref<1x8x32xf32, #tpu.memory_space<vmem>>, %arg3: memref<1x32x24xf32, #tpu.memory_space<vmem>>, %arg4: memref<1x1x24xf32, #tpu.memory_space<vmem>>, %arg5: memref<1x8x32xf32, #tpu.memory_space<vmem>>, %arg6: memref<1x32xf32, #tpu.memory_space<vmem>>, %arg7: memref<1x8x32xf32, #tpu.memory_space<vmem>>, %arg8: memref<8x32xf32, #tpu.memory_space<vmem>>) attributes {dimension_semantics = [#tpu.dimension_semantics<parallel>, #tpu.dimension_semantics<arbitrary>], iteration_bounds = array<i64: 2, 4>, scalar_prefetch = 0 : i64, scratch_operands = 1 : i64, tpu.core_type = #tpu.core_type<tc>, window_params = [{transform_indices = @transform_0, window_bounds = array<i64: 1, 8, 32>}, {transform_indices = @transform_1, window_bounds = array<i64: 1, 32, 24>}, {transform_indices = @transform_2, window_bounds = array<i64: 1, 1, 24>}, {transform_indices = @transform_3, window_bounds = array<i64: 1, 8, 32>}, {pipeline_mode = #tpu.pipeline_mode<synchronous>, transform_indices = @transform_4, window_bounds = array<i64: 1, 32>}, {transform_indices = @transform_5, window_bounds = array<i64: 1, 8, 32>}]} {
    %c0_i32 = arith.constant 0 : i32
    %0 = arith.cmpi eq, %arg1, %c0_i32 : i32
    %1 = arith.extui %0 : i1 to i32
    %c0_i32_0 = arith.constant 0 : i32
    %2 = arith.cmpi ne, %1, %c0_i32_0 : i32
    scf.if %2 {
      %cst_22 = arith.constant 0.000000e+00 : f32
      %39 = vector.broadcast %cst_22 : f32 to vector<8x32xf32>
      %c0_23 = arith.constant 0 : index
      %c0_24 = arith.constant 0 : index
      %40 = vector.load %arg8[%c0_23, %c0_24] : memref<8x32xf32, #tpu.memory_space<vmem>>, vector<8x32xf32>
      tpu.vector_store %arg8[%c0_23, %c0_24], %39 {strides = array<i32>} : memref<8x32xf32, #tpu.memory_space<vmem>>, vector<8x32xf32>,
    } else {
    }
    %c0 = arith.constant 0 : index
    %c0_1 = arith.constant 0 : index
    %c0_2 = arith.constant 0 : index
    %3 = vector.load %arg2[%c0, %c0_1, %c0_2] : memref<1x8x32xf32, #tpu.memory_space<vmem>>, vector<1x8x32xf32>
    %4 = vector.shape_cast %3 : vector<1x8x32xf32> to vector<8x32xf32>
    %c0_3 = arith.constant 0 : index
    %c0_4 = arith.constant 0 : index
    %c0_5 = arith.constant 0 : index
    %5 = vector.load %arg3[%c0_3, %c0_4, %c0_5] : memref<1x32x24xf32, #tpu.memory_space<vmem>>, vector<1x32x24xf32>
    %6 = vector.shape_cast %5 : vector<1x32x24xf32> to vector<32x24xf32>
    %cst = arith.constant dense<0.000000e+00> : vector<8x24xf32>
    %7 = tpu.matmul %4, %6, %cst {dimension_numbers = #tpu.dot_dimension_numbers<[1], [0], [0], [1], [0, 0, 1, 1], [], []>} : vector<8x32xf32>, vector<32x24xf32>, vector<8x24xf32> -> vector<8x24xf32>
    %c0_6 = arith.constant 0 : index
    %c0_7 = arith.constant 0 : index
    %c0_8 = arith.constant 0 : index
    %8 = vector.load %arg4[%c0_6, %c0_7, %c0_8] : memref<1x1x24xf32, #tpu.memory_space<vmem>>, vector<1x1x24xf32>
    %9 = vector.shape_cast %8 : vector<1x1x24xf32> to vector<1x24xf32>
    %10 = vector.broadcast %9 : vector<1x24xf32> to vector<8x24xf32>
    %11 = arith.addf %7, %10 : vector<8x24xf32>
    %12 = vector.extract_strided_slice %11 {offsets = [0, 0], sizes = [8, 8], strides = [1, 1]} : vector<8x24xf32> to vector<8x8xf32>
    %13 = vector.shape_cast %12 : vector<8x8xf32> to vector<1x8x8xf32>
    %14 = vector.extract_strided_slice %11 {offsets = [0, 8], sizes = [8, 8], strides = [1, 1]} : vector<8x24xf32> to vector<8x8xf32>
    %15 = vector.shape_cast %14 : vector<8x8xf32> to vector<1x8x8xf32>
    %16 = vector.extract_strided_slice %11 {offsets = [0, 16], sizes = [8, 8], strides = [1, 1]} : vector<8x24xf32> to vector<8x8xf32>
    %17 = vector.shape_cast %16 : vector<8x8xf32> to vector<1x8x8xf32>
    %cst_9 = arith.constant dense<0.000000e+00> : vector<1x8x8xf32>
    %18 = tpu.matmul %13, %15, %cst_9 {dimension_numbers = #tpu.dot_dimension_numbers<[2], [2], [1], [1], [0, 0, 0, 1, 1, 1], [0], [0]>} : vector<1x8x8xf32>, vector<1x8x8xf32>, vector<1x8x8xf32> -> vector<1x8x8xf32>
    %cst_10 = arith.constant dense<0xFF800000> : vector<1x8xf32>
    %19 = vector.multi_reduction <maximumf>, %18, %cst_10 [2] : vector<1x8x8xf32> to vector<1x8xf32>
    %20 = vector.shape_cast %19 : vector<1x8xf32> to vector<1x8x1xf32>
    %21 = vector.broadcast %20 : vector<1x8x1xf32> to vector<1x8x8xf32>
    %22 = arith.subf %18, %21 : vector<1x8x8xf32>
    %23 = math.exp %22 : vector<1x8x8xf32>
    %cst_11 = arith.constant dense<0.000000e+00> : vector<1x8xf32>
    %24 = vector.multi_reduction <add>, %23, %cst_11 [2] : vector<1x8x8xf32> to vector<1x8xf32>
    %25 = vector.shape_cast %24 : vector<1x8xf32> to vector<1x8x1xf32>
    %cst_12 = arith.constant dense<0.000000e+00> : vector<1x8x8xf32>
    %26 = tpu.matmul %23, %17, %cst_12 {dimension_numbers = #tpu.dot_dimension_numbers<[2], [1], [1], [2], [0, 0, 0, 1, 1, 2], [0], [0]>} : vector<1x8x8xf32>, vector<1x8x8xf32>, vector<1x8x8xf32> -> vector<1x8x8xf32>
    %27 = vector.broadcast %25 : vector<1x8x1xf32> to vector<1x8x8xf32>
    %28 = arith.divf %26, %27 : vector<1x8x8xf32>
    %29 = vector.shape_cast %28 : vector<1x8x8xf32> to vector<8x8xf32>
    %c0_13 = arith.constant 0 : index
    %c0_14 = arith.constant 0 : index
    %30 = vector.load %arg8[%c0_13, %c0_14] : memref<8x32xf32, #tpu.memory_space<vmem>>, vector<8x32xf32>
    %c0_15 = arith.constant 0 : index
    %c0_16 = arith.constant 0 : index
    %c0_17 = arith.constant 0 : index
    %31 = vector.load %arg5[%c0_15, %c0_16, %c0_17] : memref<1x8x32xf32, #tpu.memory_space<vmem>>, vector<1x8x32xf32>
    %32 = vector.shape_cast %31 : vector<1x8x32xf32> to vector<8x32xf32>
    %cst_18 = arith.constant dense<0.000000e+00> : vector<8x32xf32>
    %33 = tpu.matmul %29, %32, %cst_18 {dimension_numbers = #tpu.dot_dimension_numbers<[1], [0], [0], [1], [0, 0, 1, 1], [], []>} : vector<8x8xf32>, vector<8x32xf32>, vector<8x32xf32> -> vector<8x32xf32>
    %34 = arith.addf %30, %33 : vector<8x32xf32>
    %c0_19 = arith.constant 0 : index
    %c0_20 = arith.constant 0 : index
    %35 = vector.load %arg8[%c0_19, %c0_20] : memref<8x32xf32, #tpu.memory_space<vmem>>, vector<8x32xf32>
    tpu.vector_store %arg8[%c0_19, %c0_20], %34 {strides = array<i32>} : memref<8x32xf32, #tpu.memory_space<vmem>>, vector<8x32xf32>,
    %c3_i32 = arith.constant 3 : i32
    %36 = arith.cmpi eq, %arg1, %c3_i32 : i32
    %37 = arith.extui %36 : i1 to i32
    %c0_i32_21 = arith.constant 0 : i32
    %38 = arith.cmpi ne, %37, %c0_i32_21 : i32
    scf.if %38 {
      %c0_22 = arith.constant 0 : index
      %c0_23 = arith.constant 0 : index
      %39 = vector.load %arg8[%c0_22, %c0_23] : memref<8x32xf32, #tpu.memory_space<vmem>>, vector<8x32xf32>
      %c0_24 = arith.constant 0 : index
      %c0_25 = arith.constant 0 : index
      %40 = vector.load %arg6[%c0_24, %c0_25] : memref<1x32xf32, #tpu.memory_space<vmem>>, vector<1x32xf32>
      %41 = vector.broadcast %40 : vector<1x32xf32> to vector<8x32xf32>
      %42 = arith.addf %39, %41 : vector<8x32xf32>
      %43 = vector.shape_cast %42 : vector<8x32xf32> to vector<1x8x32xf32>
      %c0_26 = arith.constant 0 : index
      %c0_27 = arith.constant 0 : index
      %c0_28 = arith.constant 0 : index
      %44 = vector.load %arg7[%c0_26, %c0_27, %c0_28] : memref<1x8x32xf32, #tpu.memory_space<vmem>>, vector<1x8x32xf32>
      tpu.vector_store %arg7[%c0_26, %c0_27, %c0_28], %43 {strides = array<i32>} : memref<1x8x32xf32, #tpu.memory_space<vmem>>, vector<1x8x32xf32>,
    } else {
    }
    return
  }
  func.func @transform_0(%arg0: i32, %arg1: i32) -> (i32, i32, i32) {
    %c0_i32 = arith.constant 0 : i32
    %c0_i32_0 = arith.constant 0 : i32
    %c0_i32_1 = arith.constant 0 : i32
    return %arg0, %c0_i32, %c0_i32_0 : i32, i32, i32
  }
  func.func @transform_1(%arg0: i32, %arg1: i32) -> (i32, i32, i32) {
    %c0_i32 = arith.constant 0 : i32
    %c0_i32_0 = arith.constant 0 : i32
    %c0_i32_1 = arith.constant 0 : i32
    return %arg1, %c0_i32, %c0_i32_0 : i32, i32, i32
  }
  func.func @transform_2(%arg0: i32, %arg1: i32) -> (i32, i32, i32) {
    %c0_i32 = arith.constant 0 : i32
    %c0_i32_0 = arith.constant 0 : i32
    %c0_i32_1 = arith.constant 0 : i32
    return %arg1, %c0_i32, %c0_i32_0 : i32, i32, i32
  }
  func.func @transform_3(%arg0: i32, %arg1: i32) -> (i32, i32, i32) {
    %c0_i32 = arith.constant 0 : i32
    %c0_i32_0 = arith.constant 0 : i32
    %c0_i32_1 = arith.constant 0 : i32
    return %arg1, %c0_i32, %c0_i32_0 : i32, i32, i32
  }
  func.func @transform_4(%arg0: i32, %arg1: i32) -> (i32, i32) {
    %c0_i32 = arith.constant 0 : i32
    %c0_i32_0 = arith.constant 0 : i32
    %c0_i32_1 = arith.constant 0 : i32
    return %c0_i32, %c0_i32_0 : i32, i32
  }
  func.func @transform_5(%arg0: i32, %arg1: i32) -> (i32, i32, i32) {
    %c0_i32 = arith.constant 0 : i32
    %c0_i32_0 = arith.constant 0 : i32
    %c0_i32_1 = arith.constant 0 : i32
    return %arg0, %c0_i32, %c0_i32_0 : i32, i32, i32
  }
}

</mosaic_0001>

<bundles_post_ra>
// kernel: tpu_custom_call.1
= control target key start
LH: loop header
LB: loop body
LE: loop exit
PB: predicated region body
PF: predicated region fallthrough
CT: control target
= control target key end

     0   :  { %10 = vsyncpa [#allocation4], 0  ;;  %s1191_s0 = inlined_call_operand.vmem [shape: f32[2,8,32], index: 0, kind: input, shape index: {}]   ;;  %s1192_s1 = inlined_call_operand.vmem [shape: f32[4,32,24], index: 1, kind: input, shape index: {}]   ;;  %s1193_s2 = inlined_call_operand.vmem [shape: f32[4,1,24], index: 2, kind: input, shape index: {}]   ;;  %s1194_s3 = inlined_call_operand.vmem [shape: f32[4,8,32], index: 3, kind: input, shape index: {}]   ;;  %s1195_s4 = inlined_call_operand.vmem [shape: f32[1,32], index: 4, kind: input, shape index: {}]   ;;  %s1196_s5 = inlined_call_operand.hbm [shape: f32[2,8,32], index: 5, kind: output, shape index: {}]  }
   0x1   :  { %12 = vsyncpa [#allocation4 + $0x1], 0  ;;  %s1019_s18 = smov 0   ;;  %s1021_s19 = smov 0  }
   0x2   :  { %s1023_s20 = smov 0   ;;  %s1025_s21 = smov 0  }
   0x3   :  { %s1027_s22 = smov 0   ;;  %s1029_s23 = smov 0  }
   0x4   :  { %s1031_s24 = smov 0   ;;  %s1033_s25 = smov 0  }
   0x5 LB: > { %1202 = sst [smem:[#allocation6_spill]] %s961_s20  ;;  %s748_s26 = sadd.s32 4294967295, %s981_s25   ;;  %s981_s25 = sphi %s1033_s25, %s18_s25   ;;  %s977_s24 = sphi %s1031_s24, %s1216_s24   ;;  %s973_s23 = sphi %s1029_s23, %s1215_s23   ;;  %s969_s22 = sphi %s1027_s22, %s1214_s22   ;;  %s965_s21 = sphi %s1025_s21, %s1213_s21   ;;  %s961_s20 = sphi %s1023_s20, %s1212_s20   ;;  %s957_s19 = sphi %s1021_s19, %s1218_s19   ;;  %s953_s18 = sphi %s1019_s18, %s1217_s18  }
   0x6   : > { %1203 = sst [smem:[#allocation7_spill]] %s973_s23  ;;  %s749_s27 = sadd.s32 4294967294, %s981_s25  }
   0x7   : > { %1204 = sst [smem:[#allocation8_spill]] %s977_s24  ;;  %s27_s28 = sadd.s32 1, %s973_s23 }
   0x8   : > { %p28_p0 = scmp.ge.s32.totalorder %s27_s28, 4  ;;  %s30_s29 = sadd.s32 1, %s977_s24 }
   0x9   : > { %p172_p1 = scmp.ne.s32.totalorder %s961_s20, %s957_s19  ;;  %p173_p2 = scmp.eq.s32.totalorder %s748_s26, 7 }
   0xa   : > { %s1220_s28 = smov (%p28_p0, %s27_s28), 0  ;;  %s1222_s29 = smov (!%p28_p0, %s30_s29), %s977_s24 }
   0xb   : > { %1205 = sst [smem:[#allocation9_spill]] %s1220_s28  ;;  %p1068_p3 = por %p173_p2, %p172_p1 }
   0xc   : > { %p178_p4 = scmp.ne.s32.totalorder %s957_s19, %s953_s18  ;;  %p32_p5 = scmp.ge.s32.totalorder %s1222_s29, 2 }
   0xd   : > { %p179_p6 = scmp.eq.s32.totalorder %s749_s27, 7  ;;  %p752_p7 = scmp.ge.s32.totalorder %s981_s25, 1 }
   0xe   : > { %p228_p8 = scmp.lt.s32.totalorder %s981_s25, 9  ;;  %s1224_s29 = smov (%p32_p5, %s1222_s29), 0 }
   0xf   : > { %1207 = sst [smem:[#allocation10_spill]] %s1224_s29  ;;  %p1078_p9 = por %p179_p6, %p178_p4 }
  0x10   : > { %p229_p10 = pnand %p752_p7, %p228_p8  ;;  %s159_s7 = ssub.s32 %s977_s24, %s1224_s29 }
  0x11   : > { %s162_s8 = sadd.s32 1, %s961_s20  ;;  %p160_p11 = scmp.eq.s32.totalorder %s159_s7, 0 }
  0x12   : > { %232 = sbr.rel (%p229_p10) target bundleno = 1132 (0x46c), region = 40  ;;  %s1197_s10 = sand.u32 (!%p229_p10), 1, %s957_s19  }
  0x13   : > { %s1086_s9 = scalar_select %p160_p11, %s961_s20, %s162_s8  }
  0x14   : > { %p267_p12 = scmp.lt.s32.totalorder (!%p229_p10), %s969_s22, 1  ;;  %s1092_s11 = sshll.u32 (!%p229_p10), %s1197_s10, 3 }
  0x15   : > { %1209 = sst [smem:[#allocation11_spill]] %s1086_s9  ;;  %p271_p13 = scmp.lt.s32.totalorder (!%p229_p10), %s965_s21, 3 }
  0x16   : > { %p758_p0 = scmp.ne.s32.totalorder (!%p229_p10), %s965_s21, 0 }
  0x17   : > { %s268_s12 = scalar_select %p267_p12, %s969_s22, 1 }
  0x18   : > { %s1097_s13 = scalar_select %p271_p13, %s965_s21, 3 }
  0x19   : > { %s754_s14 = sshll.u32 %s268_s12, 3  ;;  %s266_s12 = scalar_lea.vmem [#allocation3], %s1092_s11 }
  0x1a   : > { %s270_s17 = scalar_lea.vmem %s1191_s0, %s754_s14  ;;  %s771_s26 = sshll.u32 %s1097_s13, 5 }
  0x1b   : > { %s275_s8 = scalar_lea.vmem %s1192_s1, %s771_s26  ;;  %s278_s28 = scalar_lea.vmem %s1193_s2, %s1097_s13 }
  0x1c   : > { %s757_s24 = sshll.u32 %s1097_s13, 3  ;;  %286 = sbr.rel (%p758_p0) target bundleno = 35 (0x23), region = 44 }
  0x1d   : > { %s1114_s20 = scalar_lea.vmem %s1194_s3, %s757_s24 }
  0x21   : > { %vm287_vm0 = vcmask 261120   ;;  %v983_v0 = vmov 0.0  }
  0x22   : > { %288 = vst.msk [vmem:[#allocation2] sm:$0xff] %vm287_vm0, %v983_v0 }
  0x23 PF: > { %v293_v1 = vld [vmem:[%s275_s8 + $0x18] sm:$0xff]  ;;  %v984_v2 = vmov 0.0   ;;  %v292_v3 = vld [vmem:[%s275_s8 + $0x10] sm:$0xff]  ;;  %vm985_vm1 = vmmov 0   ;;  %v291_v4 = vld [vmem:[%s275_s8 + $0x8] sm:$0xff]  ;;  %vm301_vm2 = vcmask 261120  }
  0x24   : > { %783 = vmatprep.subr.mxu0 %v984_v2  ;;  %791 = vmatprep.mubr.msk.f32.mxu0 %vm985_vm1, %v984_v2  ;;  %v290_v5 = vld [vmem:[%s275_s8] sm:$0xff]  ;;  %s986_s29 = smov 112   ;;  %s987_s9 = smov 120   ;;  %vm378_vm3 = vcmask 64512  }
  0x25   : > { %784 = vmatpush3.msra.mxu0 %v293_v1  ;;  %794 = vmatprep.subr.mxu1 %v984_v2  ;;  %v289_v6 = vld [vmem:[%s270_s17] sm:$0xff]  ;;  %p765_p1 = scmp.ne.s32.totalorder %s965_s21, 3 }
  0x26   : > { %785 = vmatprep.subr.mxu0 %v984_v2  ;;  %796 = vmatprep.mubr.msk.f32.mxu1 %vm985_vm1, %v984_v2  ;;  %v759_v7 = vld [vmem:[%s278_s28] ss:$0 sm:$0xff] }
  0x27   : > { %786 = vmatpush3.msra.mxu0 %v292_v3  ;;  %v541_v21 = vld [vmem:[%s1114_s20] sm:$0xff] }
  0x28   : > { %787 = vmatprep.subr.mxu0 %v984_v2 }
  0x29   : > { %788 = vmatpush3.msra.mxu0 %v291_v4  ;;  %v540_v27 = vld [vmem:[#allocation2] sm:$0xff] }
  0x2a   : > { %789 = vmatprep.subr.mxu0 %v984_v2 }
  0x2b   : > { %790 = vmatpush3.msra.mxu0 %v290_v5 }
  0x2c   : > { %792 = vmatmul.mubr.msk.f32.vlgmr.msra.gmra.mxu0 %vm301_vm2, %v289_v6  ;;  %804 = vmatprep.subr.mxu0 %v984_v2 }
  0x2d   : > { %806 = vmatprep.mubr.msk.f32.mxu0 %vm985_vm1, %v984_v2  ;;  %805 = vmatpush3.msra.mxu0 %v541_v21 }
  0xec   : > { %v371_v8 = vpop.f32.mrf.mxu0 }
  0xed   : > { %v372_v9 = vadd.f32 %v759_v7, %v371_v8 }
  0xee   : > { %v793_v10 = vpop.f32.mrf.mxu0 }
  0xef   : > { %462 = vrot.lane.b32.xlu1 %v372_v9, %s986_s29  ;;  %376 = vrot.lane.b32.xlu0 %v372_v9, %s987_s9 }
 0x161   : > { %v377_v11 = vpop.permute.xlu0 %376  ;;  %v463_v12 = vpop.permute.xlu1 %462 }
 0x162   : > { %795 = vmatpush3.xpose.msk.msra.mxu1 %vm378_vm3, %v377_v11 }
 0x163   : > { %799 = vmatprep.subr.mxu1 %v984_v2 }
 0x165   : > { %797 = vmatmul.mubr.msk.f32.vlgmr.msra.gmra.mxu1 %vm378_vm3, %v372_v9 }
 0x166   : > { %800 = vmatpush3.msra.mxu1 %v463_v12  ;;  %801 = vmatprep.mubr.msk.f32.mxu1 %vm985_vm1, %v984_v2 }
 0x225   : > { %v449_v13 = vpop.f32.mrf.mxu1 }
 0x226   : > { %v453_v14 = vsel %vm378_vm3, %v449_v13, -inf }
 0x227   : > { %454 = vmax.xlane.f32.xlu0 %v453_v14  ;;  %v798_v15 = vpop.f32.mrf.mxu1 }
 0x2b0   : > { %v455_v16 = vpop.xlane.xlu0 %454 }
 0x2b1   : > { %v456_v17 = vsub.f32 %v449_v13, %v455_v16 }
 0x2b3   : > { %v457_v18 = vmul.f32 1.442695, %v456_v17 }
 0x2b5   : > { %885 = vpow2.f32 %v457_v18 }
 0x2c2   : > { %v886_v19 = vpop.eup %885 }
 0x2c3   : > { %802 = vmatmul.mubr.msk.f32.vlgmr.msra.gmra.mxu1 %vm378_vm3, %v886_v19  ;;  %v459_v20 = vsel %vm378_vm3, %v886_v19, 0.0 }
 0x2c4   : > { %460 = vadd.xlane.f32.xlu1 %v459_v20 }
 0x34d   : > { %v461_v22 = vpop.xlane.xlu1 %460 }
 0x34e   : > { %887 = vrcp.f32 %v461_v22 }
 0x35b   : > { %v888_v23 = vpop.eup %887 }
 0x383   : > { %v534_v24 = vpop.f32.mrf.mxu1 }
 0x384   : > { %v539_v25 = vmul.f32 %v888_v23, %v534_v24 }
 0x385   : > { %v803_v26 = vpop.f32.mrf.mxu1 }
 0x386   : > { %807 = vmatmul.mubr.msk.f32.vlgmr.msra.gmra.mxu0 %vm378_vm3, %v539_v25 }
 0x445   : > { %620 = sbr.rel (%p765_p1) target bundleno = 1108 (0x454), region = 48 }
 0x446   : > { %v611_v28 = vpop.f32.mrf.mxu0 }
 0x447   : > { %v615_v29 = vadd.f32 %v611_v28, %v540_v27 }
 0x448   : > { %v808_v30 = vpop.f32.mrf.mxu0 }
 0x449   : > { %616 = vst.msk [vmem:[#allocation2] sm:$0xff] %vm301_vm2, %v615_v29 }
 0x44a   : > { %v766_v32 = vld [vmem:[%s1195_s4] ss:$0 sm:$0xff] }
 0x450   : > { %v621_v31 = vld [vmem:[#allocation2] sm:$0xff] }
 0x451   : > { %v629_v33 = vadd.f32 %v766_v32, %v621_v31 }
 0x453   : > { %630 = vst.msk [vmem:[%s266_s12] sm:$0xff] %vm301_vm2, %v629_v33 }
 0x454 PF: > { %s768_s10 = sshll.u32 %s969_s22, 7  ;;  %s645_s15 = sshll.u32 %s266_s12, 4  ;;  %s646_s15 = int_to_ptr.vmem [resolvable:$true] %s645_s15 }
 0x455   : > { %s643_s21 = scalar_lea.hbm %s1196_s5, %s768_s10  ;;  %s1210_s16 = sand.u32 1, %s957_s19  }
 0x456   : > { %s632_s17 = scalar_lea.sflag [#allocation4], %s1210_s16  ;;  %s889_s26 = scalar_lea.vmem %s646_s15, 128 }
 0x457   : > { %p890_p2 = scmp.ne.s32.totalorder %s646_s15, %s889_s26  ;;  %s988_s27 = smov [#allocation3]  }
 0x458   : > { %s893_s7 = sshll.u32 %s988_s27, 4  ;;  %s894_s7 = int_to_ptr.vmem [resolvable:$false] %s893_s7 }
 0x459   : > { %p891_p4 = pnand %p890_p2, %p1068_p3  ;;  %s895_s8 = scalar_lea.vmem %s894_s7, 256 }
 0x45a   : > { %p896_p6 = scmp.lt.s32.totalorder %s646_s15, %s894_s7  ;;  %p897_p7 = scmp.lt.s32.totalorder %s895_s8, %s889_s26 }
 0x45b   : > { %p892_p5 = pneg %p891_p4 }
 0x45c   : > { %p898_p8 = por %p897_p7, %p896_p6 }
 0x45e   : > { %p899_p10 = pnand %p898_p8, %p892_p5 }
 0x460   : > { %902 = shalt.err (!%p899_p10)
}
 0x461   : > { %s903_s22 = scalar_lea.hbm %s643_s21, 128  ;;  %s907_s23 = scalar_lea.hbm %s1196_s5, 256 }
 0x462   : > { %p904_p11 = scmp.ne.s32.totalorder %s643_s21, %s903_s22  ;;  %p908_p0 = scmp.lt.s32.totalorder %s643_s21, %s1196_s5 }
 0x463   : > { %p909_p1 = scmp.lt.s32.totalorder %s907_s23, %s903_s22 }
 0x464   : > { %p905_p12 = pnand %p904_p11, %p1068_p3 }
 0x465   : > { %p910_p2 = por %p909_p1, %p908_p0 }
 0x466   : > { %p906_p13 = pneg %p905_p12 }
 0x468   : > { %p911_p4 = pnand %p910_p2, %p906_p13 }
 0x46a   : > { %914 = shalt.err (!%p911_p4)
}
 0x46b   : > { %809 = dma.vmem_to_hbm [thread:$0]  (%p1068_p3), %s646_s15, 128, %s643_s21, %s632_s17  }
 0x46c PF: > { %p815_p5 = scmp.ge.s32.totalorder %s981_s25, 2  ;;  %s657_s9 = sand.u32 1, %s953_s18  }
 0x46d   : > { %s658_s20 = scalar_lea.sflag [#allocation4], %s657_s9 }
 0x46e   : > { %p812_p6 = pnand %p815_p5, %p1078_p9 }
 0x470   : > { %p813_p7 = pneg %p812_p6 }
 0x472   : > { %948 = dma.done.wait (%p813_p7), %s658_s20, 128  }
 0x473   : > { %950 = vsyncadd (%p813_p7), %s658_s20, 4294967168  ;;  %s18_s25 = sadd.s32 1, %s981_s25   ;;  %s1211_s28 = sld [smem:[#allocation6_spill]] }
 0x474   : > { %p15_p8 = scmp.ge.s32.totalorder %s18_s25, 10   ;;  %s1212_s20 = sld [smem:[#allocation11_spill]] }
 0x475   : > { %s1213_s21 = sld [smem:[#allocation7_spill]]  ;;  %s1217_s18 = smov %s957_s19 }
 0x476   : > { %s1214_s22 = sld [smem:[#allocation8_spill]]  ;;  %17 = sbr.rel (!%p15_p8) target bundleno = 5 (0x5), region = 92 }
 0x477   : > { %s1215_s23 = sld [smem:[#allocation9_spill]] }
 0x478   : > { %s1216_s24 = sld [smem:[#allocation10_spill]] }
 0x479   : > { %s1218_s19 = smov %s1211_s28 }
 0x47b   :  { %663 = vsyncpa [#allocation4], 1 }
 0x47c   :  { %665 = vsyncpa [#allocation4 + $0x1], 1 }

</bundles_post_ra>
